<compile_context>
chip_gen: v7x
topology: tpu7x:2x2x1
jax: 0.10.0
libtpu: 0.0.40
codegen_flags: <defaults>
</compile_context>

<pallas_src>
import jax
import jax.numpy as jnp
from jax.experimental import pallas as pl
from jax.experimental.pallas import tpu as pltpu


def _round_up(x: int, m: int) -> int:
    return ((x + m - 1) // m) * m


def _autoencoder_kernel(x_ref, w_enc_ref, b_enc_ref, w_dec_ref, b_dec_ref,
                        dec_ref, enc_ref):
    # x arrives f32; cast to bf16 on the VPU right before the MXU dot (avoids a
    # separate wrapper-side pad+astype pass over x).
    x = x_ref[...].astype(jnp.bfloat16)                        # (TB, Dp)

    # encoded = relu(x @ W_enc + b_enc)   (bf16 MXU inputs, f32 accumulation)
    enc = jnp.dot(x, w_enc_ref[...], preferred_element_type=jnp.float32)
    enc = jnp.maximum(enc + b_enc_ref[...], 0.0)               # f32 VPU epilogue

    # Store encoded as the exact bf16 value the decoder consumes (bit-identical),
    # halving encoded writeback bytes.
    enc_bf = enc.astype(jnp.bfloat16)
    enc_ref[...] = enc_bf

    # decoded = relu(encoded @ W_dec + b_dec)
    dec = jnp.dot(enc_bf, w_dec_ref[...], preferred_element_type=jnp.float32)
    dec = jnp.maximum(dec + b_dec_ref[...], 0.0)
    dec_ref[...] = dec.astype(dec_ref.dtype)                   # bf16 writeback


_VMEM_BUDGET = 48 * 1024 * 1024   # fits v7x's 64 MiB/TC as well as v5e/v6e's 128 MiB


def _working_set_bytes(tb: int, dp: int, hp: int) -> int:
    bf16, f32 = 2, 4
    weights = 2 * (dp * hp + hp * dp) * bf16                 # conservative: 2 buffers
    biases = 2 * (hp + dp) * f32
    streamed = 2 * tb * (dp * f32 + dp * bf16 + hp * bf16)   # x in + dec/enc out
    return weights + biases + streamed


def _choose_batch_tile(b: int, block_b: int, dp: int, hp: int) -> int:
    tb = max(8, (min(block_b, _round_up(b, 8)) // 8) * 8)
    # Shrink until the double-buffered working set fits the conservative budget.
    while tb > 8 and _working_set_bytes(tb, dp, hp) > _VMEM_BUDGET:
        tb = max(8, (tb // 2 // 8) * 8)
    # Shrink for awkward batch tails: never waste >25% of padded rows (floor 64).
    while tb > 64 and (_round_up(b, tb) - b) * 4 > _round_up(b, tb):
        tb = max(64, (tb // 2 // 8) * 8)
    return tb


def autoencoder_forward(x, w_enc, b_enc, w_dec, b_dec, *, block_b: int = 512):
    """Pallas forward matching torch Autoencoder.forward.

    Args:
      x:      [B, input_size]            float32
      w_enc:  [input_size, hidden_size]  (transposed from torch [out, in])
      b_enc:  [hidden_size]
      w_dec:  [hidden_size, input_size]
      b_dec:  [input_size]
    Returns:
      (decoded [B, input_size], encoded [B, hidden_size]), both bfloat16.
      `encoded` is exactly the bf16 value the decoder consumed.
    """
    B, in_size = x.shape
    hidden = w_enc.shape[1]

    # Lane-dense padding.  Hidden rounds to 256 only when genuinely large.
    Dp = _round_up(in_size, 128)
    Hp = _round_up(hidden, 256) if hidden >= 256 else _round_up(hidden, 128)
    TB = _choose_batch_tile(B, block_b, Dp, Hp)
    Bp = _round_up(B, TB)

    def pad2(a, rows, cols):
        pr, pc = rows - a.shape[0], cols - a.shape[1]
        return jnp.pad(a, ((0, pr), (0, pc))) if (pr or pc) else a

    # x stays f32 (cast to bf16 inside the kernel); weights are small, cast once.
    x_p = pad2(x, Bp, Dp)
    w_enc_p = pad2(w_enc, Dp, Hp).astype(jnp.bfloat16)
    w_dec_p = pad2(w_dec, Hp, Dp).astype(jnp.bfloat16)
    b_enc_p = pad2(b_enc.reshape(1, hidden), 1, Hp).astype(jnp.float32)
    b_dec_p = pad2(b_dec.reshape(1, in_size), 1, Dp).astype(jnp.float32)

    # Explicit scoped-VMEM limit from the actual working set (+~30% headroom);
    # the 16/32 MiB defaults can otherwise reject large batch tiles.
    ws = _working_set_bytes(TB, Dp, Hp)
    vmem_limit = max(16 * 1024 * 1024, min(int(ws * 1.3), 56 * 1024 * 1024))
    # TODO(synk): for weights too large for whole-matrix VMEM residency (v7x has
    # 64 MiB/TC), restructure to a (batch, K) grid with an f32 VMEM accumulator.

    grid = (Bp // TB,)
    out_shape = (
        jax.ShapeDtypeStruct((Bp, Dp), jnp.bfloat16),   # decoded (padded)
        jax.ShapeDtypeStruct((Bp, Hp), jnp.bfloat16),   # encoded (padded)
    )

    def build_call(resident_kwargs):
        resident = lambda shape: pl.BlockSpec(shape, lambda i: (0, 0),
                                              **resident_kwargs)
        return pl.pallas_call(
            _autoencoder_kernel,
            out_shape=out_shape,
            grid=grid,
            in_specs=[
                pl.BlockSpec((TB, Dp), lambda i: (i, 0)),    # x: streamed per tile
                resident((Dp, Hp)),                          # w_enc: VMEM-resident
                resident((1, Hp)),                           # b_enc: resident
                resident((Hp, Dp)),                          # w_dec: resident
                resident((1, Dp)),                           # b_dec: resident
            ],
            out_specs=(
                pl.BlockSpec((TB, Dp), lambda i: (i, 0)),    # decoded
                pl.BlockSpec((TB, Hp), lambda i: (i, 0)),    # encoded
            ),
            compiler_params=pltpu.CompilerParams(
                dimension_semantics=("parallel",),           # megacore on v7x
                vmem_limit_bytes=vmem_limit),
        )

    args = (x_p, w_enc_p, b_enc_p, w_dec_p, b_dec_p)
    try:
        # Constant-index blocks never change -> single buffer halves the resident
        # weight VMEM footprint (matters most on v7x's 64 MiB/TC).
        decoded_p, encoded_p = build_call(
            {"pipeline_mode": pl.Buffered(1)})(*args)
    except Exception:
        # pipeline_mode / Buffered(1) not supported on this JAX build; default
        # double-buffering is still covered by the working-set budget above.
        decoded_p, encoded_p = build_call({})(*args)

    return decoded_p[:B, :in_size], encoded_p[:B, :hidden]


def init_params(key, input_size, hidden_size):
    """Deterministic init mimicking PyTorch Linear's U(-1/sqrt(fan_in), ...)."""
    k1, k2, k3, k4 = jax.random.split(key, 4)
    bound_e = 1.0 / jnp.sqrt(input_size)
    bound_d = 1.0 / jnp.sqrt(hidden_size)
    # Stored directly in [in, out] layout (transpose of torch's [out, in]).
    w_enc = jax.random.uniform(k1, (input_size, hidden_size), jnp.float32,
                               minval=-bound_e, maxval=bound_e)
    b_enc = jax.random.uniform(k2, (hidden_size,), jnp.float32,
                               minval=-bound_e, maxval=bound_e)
    w_dec = jax.random.uniform(k3, (hidden_size, input_size), jnp.float32,
                               minval=-bound_d, maxval=bound_d)
    b_dec = jax.random.uniform(k4, (input_size,), jnp.float32,
                               minval=-bound_d, maxval=bound_d)
    return w_enc, b_enc, w_dec, b_dec


if __name__ == "__main__":
    key = jax.random.PRNGKey(0)
    k_x, k_p = jax.random.split(key)

    # Small shapes; B=10 / input=120 / hidden=32 exercise batch, feature and
    # hidden padding paths.
    B, INPUT_SIZE, HIDDEN_SIZE = 10, 120, 32
    x = jax.random.normal(k_x, (B, INPUT_SIZE), dtype=jnp.float32)
    w_enc, b_enc, w_dec, b_dec = init_params(k_p, INPUT_SIZE, HIDDEN_SIZE)

    decoded, encoded = autoencoder_forward(x, w_enc, b_enc, w_dec, b_dec)
    jax.block_until_ready((decoded, encoded))

    # Pure-JAX reference with the same bf16 rounding / f32 accumulation.
    hi = jax.lax.Precision.HIGHEST
    xb = x.astype(jnp.bfloat16).astype(jnp.float32)
    web = w_enc.astype(jnp.bfloat16).astype(jnp.float32)
    wdb = w_dec.astype(jnp.bfloat16).astype(jnp.float32)
    enc_f32 = jnp.maximum(jnp.dot(xb, web, precision=hi) + b_enc, 0.0)
    enc_bf = enc_f32.astype(jnp.bfloat16)
    dec_f32 = jnp.maximum(
        jnp.dot(enc_bf.astype(jnp.float32), wdb, precision=hi) + b_dec, 0.0)

    assert decoded.shape == (B, INPUT_SIZE) and encoded.shape == (B, HIDDEN_SIZE)
    assert decoded.dtype == jnp.bfloat16 and encoded.dtype == jnp.bfloat16
    assert jnp.allclose(encoded.astype(jnp.float32), enc_bf.astype(jnp.float32),
                        atol=2e-2, rtol=2e-2)
    assert jnp.allclose(decoded.astype(jnp.float32), dec_f32,
                        atol=2e-2, rtol=2e-2)

    print("KERNEL_OK")
</pallas_src>

<mosaic_0001>
module attributes {stable_mosaic.version = 11 : i64} {
  func.func @_autoencoder_kernel(%arg0: i32, %arg1: memref<16x128xf32, #tpu.memory_space<vmem>>, %arg2: memref<128x128xbf16, #tpu.memory_space<vmem>>, %arg3: memref<1x128xf32, #tpu.memory_space<vmem>>, %arg4: memref<128x128xbf16, #tpu.memory_space<vmem>>, %arg5: memref<1x128xf32, #tpu.memory_space<vmem>>, %arg6: memref<16x128xbf16, #tpu.memory_space<vmem>>, %arg7: memref<16x128xbf16, #tpu.memory_space<vmem>>) attributes {dimension_semantics = [#tpu.dimension_semantics<parallel>], iteration_bounds = array<i64: 1>, scalar_prefetch = 0 : i64, scratch_operands = 0 : i64, tpu.core_type = #tpu.core_type<tc>, window_params = [{transform_indices = @transform_0, window_bounds = array<i64: 16, 128>}, {pipeline_mode = #tpu.pipeline_mode<synchronous>, transform_indices = @transform_1, window_bounds = array<i64: 128, 128>}, {pipeline_mode = #tpu.pipeline_mode<synchronous>, transform_indices = @transform_2, window_bounds = array<i64: 1, 128>}, {pipeline_mode = #tpu.pipeline_mode<synchronous>, transform_indices = @transform_3, window_bounds = array<i64: 128, 128>}, {pipeline_mode = #tpu.pipeline_mode<synchronous>, transform_indices = @transform_4, window_bounds = array<i64: 1, 128>}, {transform_indices = @transform_5, window_bounds = array<i64: 16, 128>}, {transform_indices = @transform_6, window_bounds = array<i64: 16, 128>}]} {
    %c0 = arith.constant 0 : index
    %c0_0 = arith.constant 0 : index
    %0 = vector.load %arg1[%c0, %c0_0] : memref<16x128xf32, #tpu.memory_space<vmem>>, vector<16x128xf32>
    %1 = arith.truncf %0 : vector<16x128xf32> to vector<16x128xbf16>
    %c0_1 = arith.constant 0 : index
    %c0_2 = arith.constant 0 : index
    %2 = vector.load %arg2[%c0_1, %c0_2] : memref<128x128xbf16, #tpu.memory_space<vmem>>, vector<128x128xbf16>
    %cst = arith.constant dense<0.000000e+00> : vector<16x128xf32>
    %3 = tpu.matmul %1, %2, %cst {dimension_numbers = #tpu.dot_dimension_numbers<[1], [0], [0], [1], [0, 0, 1, 1], [], []>} : vector<16x128xbf16>, vector<128x128xbf16>, vector<16x128xf32> -> vector<16x128xf32>
    %c0_3 = arith.constant 0 : index
    %c0_4 = arith.constant 0 : index
    %4 = vector.load %arg3[%c0_3, %c0_4] : memref<1x128xf32, #tpu.memory_space<vmem>>, vector<1x128xf32>
    %5 = vector.broadcast %4 : vector<1x128xf32> to vector<16x128xf32>
    %6 = arith.addf %3, %5 : vector<16x128xf32>
    %cst_5 = arith.constant 0.000000e+00 : f32
    %7 = vector.broadcast %cst_5 : f32 to vector<16x128xf32>
    %8 = arith.maximumf %6, %7 : vector<16x128xf32>
    %9 = arith.truncf %8 : vector<16x128xf32> to vector<16x128xbf16>
    %c0_6 = arith.constant 0 : index
    %c0_7 = arith.constant 0 : index
    %10 = vector.load %arg7[%c0_6, %c0_7] : memref<16x128xbf16, #tpu.memory_space<vmem>>, vector<16x128xbf16>
    tpu.vector_store %arg7[%c0_6, %c0_7], %9 {strides = array<i32>} : memref<16x128xbf16, #tpu.memory_space<vmem>>, vector<16x128xbf16>,
    %c0_8 = arith.constant 0 : index
    %c0_9 = arith.constant 0 : index
    %11 = vector.load %arg4[%c0_8, %c0_9] : memref<128x128xbf16, #tpu.memory_space<vmem>>, vector<128x128xbf16>
    %cst_10 = arith.constant dense<0.000000e+00> : vector<16x128xf32>
    %12 = tpu.matmul %9, %11, %cst_10 {dimension_numbers = #tpu.dot_dimension_numbers<[1], [0], [0], [1], [0, 0, 1, 1], [], []>} : vector<16x128xbf16>, vector<128x128xbf16>, vector<16x128xf32> -> vector<16x128xf32>
    %c0_11 = arith.constant 0 : index
    %c0_12 = arith.constant 0 : index
    %13 = vector.load %arg5[%c0_11, %c0_12] : memref<1x128xf32, #tpu.memory_space<vmem>>, vector<1x128xf32>
    %14 = vector.broadcast %13 : vector<1x128xf32> to vector<16x128xf32>
    %15 = arith.addf %12, %14 : vector<16x128xf32>
    %cst_13 = arith.constant 0.000000e+00 : f32
    %16 = vector.broadcast %cst_13 : f32 to vector<16x128xf32>
    %17 = arith.maximumf %15, %16 : vector<16x128xf32>
    %18 = arith.truncf %17 : vector<16x128xf32> to vector<16x128xbf16>
    %c0_14 = arith.constant 0 : index
    %c0_15 = arith.constant 0 : index
    %19 = vector.load %arg6[%c0_14, %c0_15] : memref<16x128xbf16, #tpu.memory_space<vmem>>, vector<16x128xbf16>
    tpu.vector_store %arg6[%c0_14, %c0_15], %18 {strides = array<i32>} : memref<16x128xbf16, #tpu.memory_space<vmem>>, vector<16x128xbf16>,
    return
  }
  func.func @transform_0(%arg0: i32) -> (i32, i32) {
    %c0_i32 = arith.constant 0 : i32
    %c0_i32_0 = arith.constant 0 : i32
    return %arg0, %c0_i32 : i32, i32
  }
  func.func @transform_1(%arg0: i32) -> (i32, i32) {
    %c0_i32 = arith.constant 0 : i32
    %c0_i32_0 = arith.constant 0 : i32
    %c0_i32_1 = arith.constant 0 : i32
    return %c0_i32, %c0_i32_0 : i32, i32
  }
  func.func @transform_2(%arg0: i32) -> (i32, i32) {
    %c0_i32 = arith.constant 0 : i32
    %c0_i32_0 = arith.constant 0 : i32
    %c0_i32_1 = arith.constant 0 : i32
    return %c0_i32, %c0_i32_0 : i32, i32
  }
  func.func @transform_3(%arg0: i32) -> (i32, i32) {
    %c0_i32 = arith.constant 0 : i32
    %c0_i32_0 = arith.constant 0 : i32
    %c0_i32_1 = arith.constant 0 : i32
    return %c0_i32, %c0_i32_0 : i32, i32
  }
  func.func @transform_4(%arg0: i32) -> (i32, i32) {
    %c0_i32 = arith.constant 0 : i32
    %c0_i32_0 = arith.constant 0 : i32
    %c0_i32_1 = arith.constant 0 : i32
    return %c0_i32, %c0_i32_0 : i32, i32
  }
  func.func @transform_5(%arg0: i32) -> (i32, i32) {
    %c0_i32 = arith.constant 0 : i32
    %c0_i32_0 = arith.constant 0 : i32
    return %arg0, %c0_i32 : i32, i32
  }
  func.func @transform_6(%arg0: i32) -> (i32, i32) {
    %c0_i32 = arith.constant 0 : i32
    %c0_i32_0 = arith.constant 0 : i32
    return %arg0, %c0_i32 : i32, i32
  }
}

module attributes {stable_mosaic.version = 11 : i64} {
  func.func @_autoencoder_kernel(%arg0: i32, %arg1: memref<16x128xf32, #tpu.memory_space<vmem>>, %arg2: memref<128x128xbf16, #tpu.memory_space<vmem>>, %arg3: memref<1x128xf32, #tpu.memory_space<vmem>>, %arg4: memref<128x128xbf16, #tpu.memory_space<vmem>>, %arg5: memref<1x128xf32, #tpu.memory_space<vmem>>, %arg6: memref<16x128xbf16, #tpu.memory_space<vmem>>, %arg7: memref<16x128xbf16, #tpu.memory_space<vmem>>) attributes {dimension_semantics = [#tpu.dimension_semantics<parallel>], iteration_bounds = array<i64: 1>, scalar_prefetch = 0 : i64, scratch_operands = 0 : i64, tpu.core_type = #tpu.core_type<tc>, window_params = [{transform_indices = @transform_0, window_bounds = array<i64: 16, 128>}, {pipeline_mode = #tpu.pipeline_mode<synchronous>, transform_indices = @transform_1, window_bounds = array<i64: 128, 128>}, {pipeline_mode = #tpu.pipeline_mode<synchronous>, transform_indices = @transform_2, window_bounds = array<i64: 1, 128>}, {pipeline_mode = #tpu.pipeline_mode<synchronous>, transform_indices = @transform_3, window_bounds = array<i64: 128, 128>}, {pipeline_mode = #tpu.pipeline_mode<synchronous>, transform_indices = @transform_4, window_bounds = array<i64: 1, 128>}, {transform_indices = @transform_5, window_bounds = array<i64: 16, 128>}, {transform_indices = @transform_6, window_bounds = array<i64: 16, 128>}]} {
    %c0 = arith.constant 0 : index
    %c0_0 = arith.constant 0 : index
    %0 = vector.load %arg1[%c0, %c0_0] : memref<16x128xf32, #tpu.memory_space<vmem>>, vector<16x128xf32>
    %1 = arith.truncf %0 : vector<16x128xf32> to vector<16x128xbf16>
    %c0_1 = arith.constant 0 : index
    %c0_2 = arith.constant 0 : index
    %2 = vector.load %arg2[%c0_1, %c0_2] : memref<128x128xbf16, #tpu.memory_space<vmem>>, vector<128x128xbf16>
    %cst = arith.constant dense<0.000000e+00> : vector<16x128xf32>
    %3 = tpu.matmul %1, %2, %cst {dimension_numbers = #tpu.dot_dimension_numbers<[1], [0], [0], [1], [0, 0, 1, 1], [], []>} : vector<16x128xbf16>, vector<128x128xbf16>, vector<16x128xf32> -> vector<16x128xf32>
    %c0_3 = arith.constant 0 : index
    %c0_4 = arith.constant 0 : index
    %4 = vector.load %arg3[%c0_3, %c0_4] : memref<1x128xf32, #tpu.memory_space<vmem>>, vector<1x128xf32>
    %5 = vector.broadcast %4 : vector<1x128xf32> to vector<16x128xf32>
    %6 = arith.addf %3, %5 : vector<16x128xf32>
    %cst_5 = arith.constant 0.000000e+00 : f32
    %7 = vector.broadcast %cst_5 : f32 to vector<16x128xf32>
    %8 = arith.maximumf %6, %7 : vector<16x128xf32>
    %9 = arith.truncf %8 : vector<16x128xf32> to vector<16x128xbf16>
    %c0_6 = arith.constant 0 : index
    %c0_7 = arith.constant 0 : index
    %10 = vector.load %arg7[%c0_6, %c0_7] : memref<16x128xbf16, #tpu.memory_space<vmem>>, vector<16x128xbf16>
    tpu.vector_store %arg7[%c0_6, %c0_7], %9 {strides = array<i32>} : memref<16x128xbf16, #tpu.memory_space<vmem>>, vector<16x128xbf16>,
    %c0_8 = arith.constant 0 : index
    %c0_9 = arith.constant 0 : index
    %11 = vector.load %arg4[%c0_8, %c0_9] : memref<128x128xbf16, #tpu.memory_space<vmem>>, vector<128x128xbf16>
    %cst_10 = arith.constant dense<0.000000e+00> : vector<16x128xf32>
    %12 = tpu.matmul %9, %11, %cst_10 {dimension_numbers = #tpu.dot_dimension_numbers<[1], [0], [0], [1], [0, 0, 1, 1], [], []>} : vector<16x128xbf16>, vector<128x128xbf16>, vector<16x128xf32> -> vector<16x128xf32>
    %c0_11 = arith.constant 0 : index
    %c0_12 = arith.constant 0 : index
    %13 = vector.load %arg5[%c0_11, %c0_12] : memref<1x128xf32, #tpu.memory_space<vmem>>, vector<1x128xf32>
    %14 = vector.broadcast %13 : vector<1x128xf32> to vector<16x128xf32>
    %15 = arith.addf %12, %14 : vector<16x128xf32>
    %cst_13 = arith.constant 0.000000e+00 : f32
    %16 = vector.broadcast %cst_13 : f32 to vector<16x128xf32>
    %17 = arith.maximumf %15, %16 : vector<16x128xf32>
    %18 = arith.truncf %17 : vector<16x128xf32> to vector<16x128xbf16>
    %c0_14 = arith.constant 0 : index
    %c0_15 = arith.constant 0 : index
    %19 = vector.load %arg6[%c0_14, %c0_15] : memref<16x128xbf16, #tpu.memory_space<vmem>>, vector<16x128xbf16>
    tpu.vector_store %arg6[%c0_14, %c0_15], %18 {strides = array<i32>} : memref<16x128xbf16, #tpu.memory_space<vmem>>, vector<16x128xbf16>,
    return
  }
  func.func @transform_0(%arg0: i32) -> (i32, i32) {
    %c0_i32 = arith.constant 0 : i32
    %c0_i32_0 = arith.constant 0 : i32
    return %arg0, %c0_i32 : i32, i32
  }
  func.func @transform_1(%arg0: i32) -> (i32, i32) {
    %c0_i32 = arith.constant 0 : i32
    %c0_i32_0 = arith.constant 0 : i32
    %c0_i32_1 = arith.constant 0 : i32
    return %c0_i32, %c0_i32_0 : i32, i32
  }
  func.func @transform_2(%arg0: i32) -> (i32, i32) {
    %c0_i32 = arith.constant 0 : i32
    %c0_i32_0 = arith.constant 0 : i32
    %c0_i32_1 = arith.constant 0 : i32
    return %c0_i32, %c0_i32_0 : i32, i32
  }
  func.func @transform_3(%arg0: i32) -> (i32, i32) {
    %c0_i32 = arith.constant 0 : i32
    %c0_i32_0 = arith.constant 0 : i32
    %c0_i32_1 = arith.constant 0 : i32
    return %c0_i32, %c0_i32_0 : i32, i32
  }
  func.func @transform_4(%arg0: i32) -> (i32, i32) {
    %c0_i32 = arith.constant 0 : i32
    %c0_i32_0 = arith.constant 0 : i32
    %c0_i32_1 = arith.constant 0 : i32
    return %c0_i32, %c0_i32_0 : i32, i32
  }
  func.func @transform_5(%arg0: i32) -> (i32, i32) {
    %c0_i32 = arith.constant 0 : i32
    %c0_i32_0 = arith.constant 0 : i32
    return %arg0, %c0_i32 : i32, i32
  }
  func.func @transform_6(%arg0: i32) -> (i32, i32) {
    %c0_i32 = arith.constant 0 : i32
    %c0_i32_0 = arith.constant 0 : i32
    return %arg0, %c0_i32 : i32, i32
  }
}

</mosaic_0001>

<bundles_post_ra>
// kernel: tpu_custom_call.1
= control target key start
LH: loop header
LB: loop body
LE: loop exit
PB: predicated region body
PF: predicated region fallthrough
CT: control target
= control target key end

     0   :  { %12 = vsyncpa [#allocation3], 0  ;;  %s714_s0 = inlined_call_operand.hbm [shape: f32[16,128], index: 0, kind: input, shape index: {}]   ;;  %s715_s1 = inlined_call_operand.hbm [shape: bf16[128,128], index: 1, kind: input, shape index: {}]   ;;  %s716_s2 = inlined_call_operand.vmem [shape: f32[1,128], index: 2, kind: input, shape index: {}]   ;;  %s717_s3 = inlined_call_operand.hbm [shape: bf16[128,128], index: 3, kind: input, shape index: {}]   ;;  %s718_s4 = inlined_call_operand.vmem [shape: f32[1,128], index: 4, kind: input, shape index: {}]   ;;  %s719_s5 = inlined_call_operand.hbm [shape: bf16[16,128], index: 5, kind: output, shape index: {0}]   ;;  %s720_s6 = inlined_call_operand.hbm [shape: bf16[16,128], index: 6, kind: output, shape index: {1}]  }
   0x1   :  { %13 = vsyncpa [#allocation6], 0 }
   0x2   :  { %14 = vsyncpa [#allocation4], 0 }
   0x3   :  { %15 = vsyncpa [#allocation10], 0  ;;  %s590_s21 = smov [#allocation5]   ;;  %s472_s25 = scalar_lea.hbm %s715_s1, 1024 }
   0x4   :  { %s33_s22 = sshll.u32 %s590_s21, 4  ;;  %p473_p0 = scmp.ne.s32.totalorder %s715_s1, %s472_s25  ;;  %s34_s22 = int_to_ptr.vmem [resolvable:$true] %s33_s22 }
   0x5   :  { %p476_p1 = scmp.lt.u32.totalorder %s472_s25, %s715_s1 }
   0x7   :  { %p478_p2 = pnand %p476_p1, %p473_p0 }
   0x9   :  { %481 = shalt.err (!%p478_p2)
}
   0xa   :  { %s482_s30 = scalar_lea.vmem %s34_s22, 1024  ;;  %p487_p4 = scmp.lt.s32.totalorder %s34_s22, %s34_s22 }
   0xb   :  { %p483_p3 = scmp.ne.s32.totalorder %s34_s22, %s482_s30  ;;  %p488_p5 = scmp.lt.s32.totalorder %s482_s30, %s482_s30 }
   0xd   :  { %p489_p6 = por %p488_p5, %p487_p4 }
   0xf   :  { %p490_p7 = pnand %p489_p6, %p483_p3 }
  0x11   :  { %493 = shalt.err (!%p490_p7)
}
  0x12   :  { %s591_s7 = smov 64   ;;  %s592_s8 = smov 4  }
  0x13   :  { %39 = dma.hbm_to_vmem [thread:$0]  %s715_s1, 1024, %s34_s22, [#allocation6], %s591_s7, %s591_s7, %s592_s8  }
  0x14   :  { %s593_s11 = smov [#allocation2]   ;;  %s494_s15 = scalar_lea.hbm %s714_s0, 256 }
  0x15   :  { %s21_s12 = sshll.u32 %s593_s11, 4  ;;  %p495_p8 = scmp.ne.s32.totalorder %s714_s0, %s494_s15  ;;  %s22_s12 = int_to_ptr.vmem [resolvable:$true] %s21_s12 }
  0x16   :  { %p498_p9 = scmp.lt.u32.totalorder %s494_s15, %s714_s0 }
  0x18   :  { %p500_p10 = pnand %p498_p9, %p495_p8 }
  0x1a   :  { %503 = shalt.err (!%p500_p10)
}
  0x1b   :  { %s504_s20 = scalar_lea.vmem %s22_s12, 256  ;;  %p509_p12 = scmp.lt.s32.totalorder %s22_s12, %s22_s12 }
  0x1c   :  { %p505_p11 = scmp.ne.s32.totalorder %s22_s12, %s504_s20  ;;  %p510_p13 = scmp.lt.s32.totalorder %s504_s20, %s504_s20 }
  0x1e   :  { %p511_p0 = por %p510_p13, %p509_p12 }
  0x20   :  { %p512_p1 = pnand %p511_p0, %p505_p11 }
  0x22   :  { %515 = shalt.err (!%p512_p1)
}
  0x23   :  { %s594_s1 = smov 128   ;;  %s595_s21 = smov 8  }
  0x24   :  { %27 = dma.hbm_to_vmem [thread:$0]  %s714_s0, 256, %s22_s12, [#allocation3], %s594_s1, %s594_s1, %s595_s21  }
  0x25   :  { %s596_s24 = smov [#allocation7]   ;;  %s516_s28 = scalar_lea.hbm %s717_s3, 1024 }
  0x26   :  { %s47_s25 = sshll.u32 %s596_s24, 4  ;;  %p517_p2 = scmp.ne.s32.totalorder %s717_s3, %s516_s28  ;;  %s48_s25 = int_to_ptr.vmem [resolvable:$true] %s47_s25 }
  0x27   :  { %p520_p3 = scmp.lt.u32.totalorder %s516_s28, %s717_s3 }
  0x29   :  { %p522_p4 = pnand %p520_p3, %p517_p2 }
  0x2b   :  { %525 = shalt.err (!%p522_p4)
}
  0x2c   :  { %s526_s11 = scalar_lea.vmem %s48_s25, 1024  ;;  %p531_p6 = scmp.lt.s32.totalorder %s48_s25, %s48_s25 }
  0x2d   :  { %p527_p5 = scmp.ne.s32.totalorder %s48_s25, %s526_s11  ;;  %p532_p7 = scmp.lt.s32.totalorder %s526_s11, %s526_s11 }
  0x2f   :  { %p533_p8 = por %p532_p7, %p531_p6 }
  0x31   :  { %p534_p9 = pnand %p533_p8, %p527_p5 }
  0x33   :  { %537 = shalt.err (!%p534_p9)
}
  0x34   :  { %53 = dma.hbm_to_vmem [thread:$0]  %s717_s3, 1024, %s48_s25, [#allocation6], %s591_s7, %s591_s7, %s592_s8  }
  0x35   :  { %582 = dma.done.wait [#allocation3], 256  }
  0x36   :  { %583 = vsyncadd [#allocation3], 4294967040 }
  0x37   :  { %584 = dma.done.wait [#allocation6], 2048  }
  0x38   :  { %585 = vsyncadd [#allocation6], 4294965248  ;;  %v597_v0 = vmov 0.0   ;;  %vm598_vm0 = vmmov 0   ;;  %v456_v1 = vld [vmem:[#allocation5] sm:$0xff]   ;;  %v457_v2 = vld [vmem:[#allocation5 + $0x8] sm:$0xff]  }
  0x39   :  { %405 = vmatprep.subr.bf16.mxu0 %v597_v0  ;;  %421 = vmatprep.mubr.msk.bf16.mxu0 %vm598_vm0, %v597_v0  ;;  %v458_v3 = vld [vmem:[#allocation5 + $0x10] sm:$0xff]   ;;  %v464_v4 = vld [vmem:[#allocation7] sm:$0xff]   ;;  %v459_v5 = vld [vmem:[#allocation5 + $0x18] sm:$0xff]   ;;  %s599_s14 = smov [#allocation9]  }
  0x3a   :  { %425 = vmatprep.subr.bf16.mxu1 %v597_v0  ;;  %441 = vmatprep.mubr.msk.bf16.mxu1 %vm598_vm0, %v597_v0  ;;  %v465_v6 = vld [vmem:[#allocation7 + $0x8] sm:$0xff]   ;;  %v460_v7 = vld [vmem:[#allocation5 + $0x20] sm:$0xff]   ;;  %v466_v8 = vld [vmem:[#allocation7 + $0x10] sm:$0xff]   ;;  %s334_s15 = sshll.u32 %s599_s14, 4  ;;  %s335_s15 = int_to_ptr.vmem [resolvable:$true] %s334_s15 }
  0x3b   :  { %406 = vmatpush3.bf16.msra.mxu0 %v456_v1  ;;  %426 = vmatpush3.bf16.msra.mxu1 %v464_v4  ;;  %v461_v9 = vld [vmem:[#allocation5 + $0x28] sm:$0xff]   ;;  %v467_v10 = vld [vmem:[#allocation7 + $0x18] sm:$0xff]   ;;  %v462_v11 = vld [vmem:[#allocation5 + $0x30] sm:$0xff]   ;;  %s538_s16 = scalar_lea.vmem %s335_s15, 128  ;;  %p543_p11 = scmp.lt.s32.totalorder %s335_s15, %s335_s15 }
  0x3c   :  { %407 = vmatprep.subr.bf16.mxu0 %v597_v0  ;;  %427 = vmatprep.subr.bf16.mxu1 %v597_v0  ;;  %v468_v12 = vld [vmem:[#allocation7 + $0x20] sm:$0xff]   ;;  %v463_v13 = vld [vmem:[#allocation5 + $0x38] sm:$0xff]   ;;  %v66_v14 = vld [vmem:[#allocation2] sm:$0xff]  ;;  %p539_p10 = scmp.ne.s32.totalorder %s335_s15, %s538_s16  ;;  %p544_p12 = scmp.lt.s32.totalorder %s538_s16, %s538_s16 }
  0x3d   :  { %v67_v15 = vld [vmem:[#allocation2 + $0x8] sm:$0xff]  ;;  %v469_v16 = vld [vmem:[#allocation7 + $0x28] sm:$0xff]   ;;  %v470_v18 = vld [vmem:[#allocation7 + $0x30] sm:$0xff]  }
  0x3e   :  { %v68_v17 = vpack.c.bf16 %v67_v15, %v66_v14  ;;  %v471_v19 = vld [vmem:[#allocation7 + $0x38] sm:$0xff]   ;;  %v351_v20 = vld [vmem:[%s716_s2] ss:$0 sm:$0xff]  ;;  %p545_p13 = por %p544_p12, %p543_p11 }
  0x3f   :  { %408 = vmatpush3.bf16.msra.mxu0 %v457_v2  ;;  %428 = vmatpush3.bf16.msra.mxu1 %v465_v6 }
  0x40   :  { %409 = vmatprep.subr.bf16.mxu0 %v597_v0  ;;  %429 = vmatprep.subr.bf16.mxu1 %v597_v0  ;;  %p546_p0 = pnand %p545_p13, %p539_p10 }
  0x43   :  { %410 = vmatpush3.bf16.msra.mxu0 %v458_v3  ;;  %430 = vmatpush3.bf16.msra.mxu1 %v466_v8 }
  0x44   :  { %411 = vmatprep.subr.bf16.mxu0 %v597_v0  ;;  %431 = vmatprep.subr.bf16.mxu1 %v597_v0 }
  0x47   :  { %412 = vmatpush3.bf16.msra.mxu0 %v459_v5  ;;  %432 = vmatpush3.bf16.msra.mxu1 %v467_v10 }
  0x48   :  { %413 = vmatprep.subr.bf16.mxu0 %v597_v0  ;;  %433 = vmatprep.subr.bf16.mxu1 %v597_v0 }
  0x4b   :  { %414 = vmatpush3.bf16.msra.mxu0 %v460_v7  ;;  %434 = vmatpush3.bf16.msra.mxu1 %v468_v12 }
  0x4c   :  { %415 = vmatprep.subr.bf16.mxu0 %v597_v0  ;;  %435 = vmatprep.subr.bf16.mxu1 %v597_v0 }
  0x4f   :  { %416 = vmatpush3.bf16.msra.mxu0 %v461_v9  ;;  %436 = vmatpush3.bf16.msra.mxu1 %v469_v16 }
  0x50   :  { %417 = vmatprep.subr.bf16.mxu0 %v597_v0  ;;  %437 = vmatprep.subr.bf16.mxu1 %v597_v0 }
  0x53   :  { %418 = vmatpush3.bf16.msra.mxu0 %v462_v11  ;;  %438 = vmatpush3.bf16.msra.mxu1 %v470_v18 }
  0x54   :  { %419 = vmatprep.subr.bf16.mxu0 %v597_v0  ;;  %439 = vmatprep.subr.bf16.mxu1 %v597_v0 }
  0x57   :  { %420 = vmatpush3.bf16.msra.mxu0 %v463_v13  ;;  %440 = vmatpush3.bf16.msra.mxu1 %v471_v19 }
  0x5a   :  { %422 = vmatmul.mubr.bf16.vlgmr.msra.gmra.mrb[0].mxu0 %v68_v17 }
 0x12d   :  { %v174_v21 = vpop.f32.mrb[0].mxu0 }
 0x12e   :  { %v175_v22 = vadd.f32 %v351_v20, %v174_v21  ;;  %v423_v23 = vpop.f32.mrb[1].mxu0 }
 0x12f   :  { %v177_v24 = vpop.f32.mrb[2].mxu0 }
 0x130   :  { %v178_v25 = vadd.f32 %v351_v20, %v177_v24  ;;  %v424_v26 = vpop.f32.mrb[3].mxu0  ;;  %v181_v27 = vmax.f32 %v175_v22, 0.0 }
 0x132   :  { %v182_v28 = vmax.f32 %v178_v25, 0.0 }
 0x134   :  { %v183_v29 = vpack.c.bf16 %v182_v28, %v181_v27 }
 0x136   :  { %381 = vst [vmem:[#allocation9] sm:$0xff] %v183_v29   ;;  %442 = vmatmul.mubr.bf16.vlgmr.msra.gmra.mrb[0].mxu1 %v183_v29 }
 0x137   :  { %549 = shalt.err (!%p546_p0)
}
 0x138   :  { %s550_s18 = scalar_lea.hbm %s720_s6, 128 }
 0x139   :  { %p551_p1 = scmp.ne.s32.totalorder %s720_s6, %s550_s18  ;;  %p554_p2 = scmp.lt.u32.totalorder %s550_s18, %s720_s6 }
 0x13b   :  { %p556_p3 = pnand %p554_p2, %p551_p1 }
 0x13d   :  { %559 = shalt.err (!%p556_p3)
}
 0x13e   :  { %340 = dma.vmem_to_hbm [thread:$0]  %s335_s15, 128, %s720_s6, [#allocation10], %s591_s7, %s591_s7, %s592_s8  }
 0x13f   :  { %v362_v30 = vld [vmem:[%s718_s4] ss:$0 sm:$0xff]  ;;  %s600_s26 = smov [#allocation8]  }
 0x140   :  { %s322_s27 = sshll.u32 %s600_s26, 4  ;;  %s323_s27 = int_to_ptr.vmem [resolvable:$true] %s322_s27 }
 0x141   :  { %s560_s28 = scalar_lea.vmem %s323_s27, 128  ;;  %p565_p5 = scmp.lt.s32.totalorder %s323_s27, %s323_s27 }
 0x142   :  { %p561_p4 = scmp.ne.s32.totalorder %s323_s27, %s560_s28  ;;  %p566_p6 = scmp.lt.s32.totalorder %s560_s28, %s560_s28 }
 0x144   :  { %p567_p7 = por %p566_p6, %p565_p5 }
 0x146   :  { %p568_p8 = pnand %p567_p7, %p561_p4 }
 0x209   :  { %v298_v31 = vpop.f32.mrb[0].mxu1 }
 0x20a   :  { %v299_v32 = vadd.f32 %v362_v30, %v298_v31  ;;  %v443_v33 = vpop.f32.mrb[1].mxu1 }
 0x20b   :  { %v301_v34 = vpop.f32.mrb[2].mxu1 }
 0x20c   :  { %v302_v35 = vadd.f32 %v362_v30, %v301_v34  ;;  %v444_v36 = vpop.f32.mrb[3].mxu1  ;;  %v305_v37 = vmax.f32 %v299_v32, 0.0 }
 0x20e   :  { %v306_v38 = vmax.f32 %v302_v35, 0.0 }
 0x210   :  { %v385_v39 = vpack.c.bf16 %v306_v38, %v305_v37 }
 0x212   :  { %386 = vst [vmem:[#allocation8] sm:$0xff] %v385_v39  }
 0x213   :  { %571 = shalt.err (!%p568_p8)
}
 0x214   :  { %s572_s29 = scalar_lea.hbm %s719_s5, 128 }
 0x215   :  { %p573_p9 = scmp.ne.s32.totalorder %s719_s5, %s572_s29  ;;  %p576_p10 = scmp.lt.u32.totalorder %s572_s29, %s719_s5 }
 0x217   :  { %p578_p11 = pnand %p576_p10, %p573_p9 }
 0x219   :  { %581 = shalt.err (!%p578_p11)
}
 0x21a   :  { %328 = dma.vmem_to_hbm [thread:$0]  %s323_s27, 128, %s719_s5, [#allocation4], %s591_s7, %s591_s7, %s592_s8  }
 0x21b   :  { %586 = dma.done.wait [#allocation4], 128  }
 0x21c   :  { %587 = vsyncadd [#allocation4], 4294967168 }
 0x21d   :  { %588 = dma.done.wait [#allocation10], 128  }
 0x21e   :  { %589 = vsyncadd [#allocation10], 4294967168 }
 0x21f   :  { %347 = vsyncpa [#allocation3], 1 }
 0x220   :  { %348 = vsyncpa [#allocation6], 1 }
 0x221   :  { %349 = vsyncpa [#allocation4], 1 }
 0x222   :  { %350 = vsyncpa [#allocation10], 1 }

// kernel: tpu_custom_call.1
= control target key start
LH: loop header
LB: loop body
LE: loop exit
PB: predicated region body
PF: predicated region fallthrough
CT: control target
= control target key end

     0   :  { %12 = vsyncpa [#allocation3], 0  ;;  %s714_s0 = inlined_call_operand.hbm [shape: f32[16,128], index: 0, kind: input, shape index: {}]   ;;  %s715_s1 = inlined_call_operand.hbm [shape: bf16[128,128], index: 1, kind: input, shape index: {}]   ;;  %s716_s2 = inlined_call_operand.vmem [shape: f32[1,128], index: 2, kind: input, shape index: {}]   ;;  %s717_s3 = inlined_call_operand.hbm [shape: bf16[128,128], index: 3, kind: input, shape index: {}]   ;;  %s718_s4 = inlined_call_operand.vmem [shape: f32[1,128], index: 4, kind: input, shape index: {}]   ;;  %s719_s5 = inlined_call_operand.hbm [shape: bf16[16,128], index: 5, kind: output, shape index: {0}]   ;;  %s720_s6 = inlined_call_operand.hbm [shape: bf16[16,128], index: 6, kind: output, shape index: {1}]  }
   0x1   :  { %13 = vsyncpa [#allocation6], 0 }
   0x2   :  { %14 = vsyncpa [#allocation4], 0 }
   0x3   :  { %15 = vsyncpa [#allocation10], 0  ;;  %s590_s21 = smov [#allocation5]   ;;  %s472_s25 = scalar_lea.hbm %s715_s1, 1024 }
   0x4   :  { %s33_s22 = sshll.u32 %s590_s21, 4  ;;  %p473_p0 = scmp.ne.s32.totalorder %s715_s1, %s472_s25  ;;  %s34_s22 = int_to_ptr.vmem [resolvable:$true] %s33_s22 }
   0x5   :  { %p476_p1 = scmp.lt.u32.totalorder %s472_s25, %s715_s1 }
   0x7   :  { %p478_p2 = pnand %p476_p1, %p473_p0 }
   0x9   :  { %481 = shalt.err (!%p478_p2)
}
   0xa   :  { %s482_s30 = scalar_lea.vmem %s34_s22, 1024  ;;  %p487_p4 = scmp.lt.s32.totalorder %s34_s22, %s34_s22 }
   0xb   :  { %p483_p3 = scmp.ne.s32.totalorder %s34_s22, %s482_s30  ;;  %p488_p5 = scmp.lt.s32.totalorder %s482_s30, %s482_s30 }
   0xd   :  { %p489_p6 = por %p488_p5, %p487_p4 }
   0xf   :  { %p490_p7 = pnand %p489_p6, %p483_p3 }
  0x11   :  { %493 = shalt.err (!%p490_p7)
}
  0x12   :  { %s591_s7 = smov 64   ;;  %s592_s8 = smov 4  }
  0x13   :  { %39 = dma.hbm_to_vmem [thread:$0]  %s715_s1, 1024, %s34_s22, [#allocation6], %s591_s7, %s591_s7, %s592_s8  }
  0x14   :  { %s593_s11 = smov [#allocation2]   ;;  %s494_s15 = scalar_lea.hbm %s714_s0, 256 }
  0x15   :  { %s21_s12 = sshll.u32 %s593_s11, 4  ;;  %p495_p8 = scmp.ne.s32.totalorder %s714_s0, %s494_s15  ;;  %s22_s12 = int_to_ptr.vmem [resolvable:$true] %s21_s12 }
  0x16   :  { %p498_p9 = scmp.lt.u32.totalorder %s494_s15, %s714_s0 }
  0x18   :  { %p500_p10 = pnand %p498_p9, %p495_p8 }
  0x1a   :  { %503 = shalt.err (!%p500_p10)
}
  0x1b   :  { %s504_s20 = scalar_lea.vmem %s22_s12, 256  ;;  %p509_p12 = scmp.lt.s32.totalorder %s22_s12, %s22_s12 }
  0x1c   :  { %p505_p11 = scmp.ne.s32.totalorder %s22_s12, %s504_s20  ;;  %p510_p13 = scmp.lt.s32.totalorder %s504_s20, %s504_s20 }
  0x1e   :  { %p511_p0 = por %p510_p13, %p509_p12 }
  0x20   :  { %p512_p1 = pnand %p511_p0, %p505_p11 }
  0x22   :  { %515 = shalt.err (!%p512_p1)
}
  0x23   :  { %s594_s1 = smov 128   ;;  %s595_s21 = smov 8  }
  0x24   :  { %27 = dma.hbm_to_vmem [thread:$0]  %s714_s0, 256, %s22_s12, [#allocation3], %s594_s1, %s594_s1, %s595_s21  }
  0x25   :  { %s596_s24 = smov [#allocation7]   ;;  %s516_s28 = scalar_lea.hbm %s717_s3, 1024 }
  0x26   :  { %s47_s25 = sshll.u32 %s596_s24, 4  ;;  %p517_p2 = scmp.ne.s32.totalorder %s717_s3, %s516_s28  ;;  %s48_s25 = int_to_ptr.vmem [resolvable:$true] %s47_s25 }
  0x27   :  { %p520_p3 = scmp.lt.u32.totalorder %s516_s28, %s717_s3 }
  0x29   :  { %p522_p4 = pnand %p520_p3, %p517_p2 }
  0x2b   :  { %525 = shalt.err (!%p522_p4)
}
  0x2c   :  { %s526_s11 = scalar_lea.vmem %s48_s25, 1024  ;;  %p531_p6 = scmp.lt.s32.totalorder %s48_s25, %s48_s25 }
  0x2d   :  { %p527_p5 = scmp.ne.s32.totalorder %s48_s25, %s526_s11  ;;  %p532_p7 = scmp.lt.s32.totalorder %s526_s11, %s526_s11 }
  0x2f   :  { %p533_p8 = por %p532_p7, %p531_p6 }
  0x31   :  { %p534_p9 = pnand %p533_p8, %p527_p5 }
  0x33   :  { %537 = shalt.err (!%p534_p9)
}
  0x34   :  { %53 = dma.hbm_to_vmem [thread:$0]  %s717_s3, 1024, %s48_s25, [#allocation6], %s591_s7, %s591_s7, %s592_s8  }
  0x35   :  { %582 = dma.done.wait [#allocation3], 256  }
  0x36   :  { %583 = vsyncadd [#allocation3], 4294967040 }
  0x37   :  { %584 = dma.done.wait [#allocation6], 2048  }
  0x38   :  { %585 = vsyncadd [#allocation6], 4294965248  ;;  %v597_v0 = vmov 0.0   ;;  %vm598_vm0 = vmmov 0   ;;  %v456_v1 = vld [vmem:[#allocation5] sm:$0xff]   ;;  %v457_v2 = vld [vmem:[#allocation5 + $0x8] sm:$0xff]  }
  0x39   :  { %405 = vmatprep.subr.bf16.mxu0 %v597_v0  ;;  %421 = vmatprep.mubr.msk.bf16.mxu0 %vm598_vm0, %v597_v0  ;;  %v458_v3 = vld [vmem:[#allocation5 + $0x10] sm:$0xff]   ;;  %v464_v4 = vld [vmem:[#allocation7] sm:$0xff]   ;;  %v459_v5 = vld [vmem:[#allocation5 + $0x18] sm:$0xff]   ;;  %s599_s14 = smov [#allocation9]  }
  0x3a   :  { %425 = vmatprep.subr.bf16.mxu1 %v597_v0  ;;  %441 = vmatprep.mubr.msk.bf16.mxu1 %vm598_vm0, %v597_v0  ;;  %v465_v6 = vld [vmem:[#allocation7 + $0x8] sm:$0xff]   ;;  %v460_v7 = vld [vmem:[#allocation5 + $0x20] sm:$0xff]   ;;  %v466_v8 = vld [vmem:[#allocation7 + $0x10] sm:$0xff]   ;;  %s334_s15 = sshll.u32 %s599_s14, 4  ;;  %s335_s15 = int_to_ptr.vmem [resolvable:$true] %s334_s15 }
  0x3b   :  { %406 = vmatpush3.bf16.msra.mxu0 %v456_v1  ;;  %426 = vmatpush3.bf16.msra.mxu1 %v464_v4  ;;  %v461_v9 = vld [vmem:[#allocation5 + $0x28] sm:$0xff]   ;;  %v467_v10 = vld [vmem:[#allocation7 + $0x18] sm:$0xff]   ;;  %v462_v11 = vld [vmem:[#allocation5 + $0x30] sm:$0xff]   ;;  %s538_s16 = scalar_lea.vmem %s335_s15, 128  ;;  %p543_p11 = scmp.lt.s32.totalorder %s335_s15, %s335_s15 }
  0x3c   :  { %407 = vmatprep.subr.bf16.mxu0 %v597_v0  ;;  %427 = vmatprep.subr.bf16.mxu1 %v597_v0  ;;  %v468_v12 = vld [vmem:[#allocation7 + $0x20] sm:$0xff]   ;;  %v463_v13 = vld [vmem:[#allocation5 + $0x38] sm:$0xff]   ;;  %v66_v14 = vld [vmem:[#allocation2] sm:$0xff]  ;;  %p539_p10 = scmp.ne.s32.totalorder %s335_s15, %s538_s16  ;;  %p544_p12 = scmp.lt.s32.totalorder %s538_s16, %s538_s16 }
  0x3d   :  { %v67_v15 = vld [vmem:[#allocation2 + $0x8] sm:$0xff]  ;;  %v469_v16 = vld [vmem:[#allocation7 + $0x28] sm:$0xff]   ;;  %v470_v18 = vld [vmem:[#allocation7 + $0x30] sm:$0xff]  }
  0x3e   :  { %v68_v17 = vpack.c.bf16 %v67_v15, %v66_v14  ;;  %v471_v19 = vld [vmem:[#allocation7 + $0x38] sm:$0xff]   ;;  %v351_v20 = vld [vmem:[%s716_s2] ss:$0 sm:$0xff]  ;;  %p545_p13 = por %p544_p12, %p543_p11 }
  0x3f   :  { %408 = vmatpush3.bf16.msra.mxu0 %v457_v2  ;;  %428 = vmatpush3.bf16.msra.mxu1 %v465_v6 }
  0x40   :  { %409 = vmatprep.subr.bf16.mxu0 %v597_v0  ;;  %429 = vmatprep.subr.bf16.mxu1 %v597_v0  ;;  %p546_p0 = pnand %p545_p13, %p539_p10 }
  0x43   :  { %410 = vmatpush3.bf16.msra.mxu0 %v458_v3  ;;  %430 = vmatpush3.bf16.msra.mxu1 %v466_v8 }
  0x44   :  { %411 = vmatprep.subr.bf16.mxu0 %v597_v0  ;;  %431 = vmatprep.subr.bf16.mxu1 %v597_v0 }
  0x47   :  { %412 = vmatpush3.bf16.msra.mxu0 %v459_v5  ;;  %432 = vmatpush3.bf16.msra.mxu1 %v467_v10 }
  0x48   :  { %413 = vmatprep.subr.bf16.mxu0 %v597_v0  ;;  %433 = vmatprep.subr.bf16.mxu1 %v597_v0 }
  0x4b   :  { %414 = vmatpush3.bf16.msra.mxu0 %v460_v7  ;;  %434 = vmatpush3.bf16.msra.mxu1 %v468_v12 }
  0x4c   :  { %415 = vmatprep.subr.bf16.mxu0 %v597_v0  ;;  %435 = vmatprep.subr.bf16.mxu1 %v597_v0 }
  0x4f   :  { %416 = vmatpush3.bf16.msra.mxu0 %v461_v9  ;;  %436 = vmatpush3.bf16.msra.mxu1 %v469_v16 }
  0x50   :  { %417 = vmatprep.subr.bf16.mxu0 %v597_v0  ;;  %437 = vmatprep.subr.bf16.mxu1 %v597_v0 }
  0x53   :  { %418 = vmatpush3.bf16.msra.mxu0 %v462_v11  ;;  %438 = vmatpush3.bf16.msra.mxu1 %v470_v18 }
  0x54   :  { %419 = vmatprep.subr.bf16.mxu0 %v597_v0  ;;  %439 = vmatprep.subr.bf16.mxu1 %v597_v0 }
  0x57   :  { %420 = vmatpush3.bf16.msra.mxu0 %v463_v13  ;;  %440 = vmatpush3.bf16.msra.mxu1 %v471_v19 }
  0x5a   :  { %422 = vmatmul.mubr.bf16.vlgmr.msra.gmra.mrb[0].mxu0 %v68_v17 }
 0x12d   :  { %v174_v21 = vpop.f32.mrb[0].mxu0 }
 0x12e   :  { %v175_v22 = vadd.f32 %v351_v20, %v174_v21  ;;  %v423_v23 = vpop.f32.mrb[1].mxu0 }
 0x12f   :  { %v177_v24 = vpop.f32.mrb[2].mxu0 }
 0x130   :  { %v178_v25 = vadd.f32 %v351_v20, %v177_v24  ;;  %v424_v26 = vpop.f32.mrb[3].mxu0  ;;  %v181_v27 = vmax.f32 %v175_v22, 0.0 }
 0x132   :  { %v182_v28 = vmax.f32 %v178_v25, 0.0 }
 0x134   :  { %v183_v29 = vpack.c.bf16 %v182_v28, %v181_v27 }
 0x136   :  { %381 = vst [vmem:[#allocation9] sm:$0xff] %v183_v29   ;;  %442 = vmatmul.mubr.bf16.vlgmr.msra.gmra.mrb[0].mxu1 %v183_v29 }
 0x137   :  { %549 = shalt.err (!%p546_p0)
}
 0x138   :  { %s550_s18 = scalar_lea.hbm %s720_s6, 128 }
 0x139   :  { %p551_p1 = scmp.ne.s32.totalorder %s720_s6, %s550_s18  ;;  %p554_p2 = scmp.lt.u32.totalorder %s550_s18, %s720_s6 }
 0x13b   :  { %p556_p3 = pnand %p554_p2, %p551_p1 }
 0x13d   :  { %559 = shalt.err (!%p556_p3)
}
 0x13e   :  { %340 = dma.vmem_to_hbm [thread:$0]  %s335_s15, 128, %s720_s6, [#allocation10], %s591_s7, %s591_s7, %s592_s8  }
 0x13f   :  { %v362_v30 = vld [vmem:[%s718_s4] ss:$0 sm:$0xff]  ;;  %s600_s26 = smov [#allocation8]  }
 0x140   :  { %s322_s27 = sshll.u32 %s600_s26, 4  ;;  %s323_s27 = int_to_ptr.vmem [resolvable:$true] %s322_s27 }
 0x141   :  { %s560_s28 = scalar_lea.vmem %s323_s27, 128  ;;  %p565_p5 = scmp.lt.s32.totalorder %s323_s27, %s323_s27 }
 0x142   :  { %p561_p4 = scmp.ne.s32.totalorder %s323_s27, %s560_s28  ;;  %p566_p6 = scmp.lt.s32.totalorder %s560_s28, %s560_s28 }
 0x144   :  { %p567_p7 = por %p566_p6, %p565_p5 }
 0x146   :  { %p568_p8 = pnand %p567_p7, %p561_p4 }
 0x209   :  { %v298_v31 = vpop.f32.mrb[0].mxu1 }
 0x20a   :  { %v299_v32 = vadd.f32 %v362_v30, %v298_v31  ;;  %v443_v33 = vpop.f32.mrb[1].mxu1 }
 0x20b   :  { %v301_v34 = vpop.f32.mrb[2].mxu1 }
 0x20c   :  { %v302_v35 = vadd.f32 %v362_v30, %v301_v34  ;;  %v444_v36 = vpop.f32.mrb[3].mxu1  ;;  %v305_v37 = vmax.f32 %v299_v32, 0.0 }
 0x20e   :  { %v306_v38 = vmax.f32 %v302_v35, 0.0 }
 0x210   :  { %v385_v39 = vpack.c.bf16 %v306_v38, %v305_v37 }
 0x212   :  { %386 = vst [vmem:[#allocation8] sm:$0xff] %v385_v39  }
 0x213   :  { %571 = shalt.err (!%p568_p8)
}
 0x214   :  { %s572_s29 = scalar_lea.hbm %s719_s5, 128 }
 0x215   :  { %p573_p9 = scmp.ne.s32.totalorder %s719_s5, %s572_s29  ;;  %p576_p10 = scmp.lt.u32.totalorder %s572_s29, %s719_s5 }
 0x217   :  { %p578_p11 = pnand %p576_p10, %p573_p9 }
 0x219   :  { %581 = shalt.err (!%p578_p11)
}
 0x21a   :  { %328 = dma.vmem_to_hbm [thread:$0]  %s323_s27, 128, %s719_s5, [#allocation4], %s591_s7, %s591_s7, %s592_s8  }
 0x21b   :  { %586 = dma.done.wait [#allocation4], 128  }
 0x21c   :  { %587 = vsyncadd [#allocation4], 4294967168 }
 0x21d   :  { %588 = dma.done.wait [#allocation10], 128  }
 0x21e   :  { %589 = vsyncadd [#allocation10], 4294967168 }
 0x21f   :  { %347 = vsyncpa [#allocation3], 1 }
 0x220   :  { %348 = vsyncpa [#allocation6], 1 }
 0x221   :  { %349 = vsyncpa [#allocation4], 1 }
 0x222   :  { %350 = vsyncpa [#allocation10], 1 }

</bundles_post_ra>
